<compile_context>
chip_gen: v6e
topology: v6e:2x2x1
jax: 0.10.0
libtpu: 0.0.40
codegen_flags: <defaults>
</compile_context>

<pallas_src>
import jax
import jax.numpy as jnp
from jax.experimental import pallas as pl
from jax.experimental.pallas import tpu as pltpu

_LANE = 128
_SUBLANE = 8
_MAX_BLOCK_BYTES = 2 * 1024 * 1024  # per-buffer cap: 4 live bufs -> <= 8 MiB VMEM


def _copy_kernel(x_ref, o_ref):
    # logits_to_preds: identity elementwise copy of the current tile.
    o_ref[...] = x_ref[...]


def _identity_2d(x2d: jax.Array, block_rows: int) -> jax.Array:
    rows, cols = x2d.shape
    grid = (rows // block_rows,)
    spec = pl.BlockSpec((block_rows, cols), lambda i: (i, 0))
    return pl.pallas_call(
        _copy_kernel,
        out_shape=jax.ShapeDtypeStruct((rows, cols), x2d.dtype),
        grid_spec=pl.GridSpec(grid=grid, in_specs=[spec], out_specs=spec),
        # Alias input -> output: no fresh HBM output allocation for the identity.
        input_output_aliases={0: 0},
        compiler_params=pltpu.CompilerParams(
            dimension_semantics=("parallel",),
        ),
    )(x2d)


def logits_to_preds(x: jax.Array) -> jax.Array:
    """Pallas equivalent of PredictorBase.logits_to_preds (identity)."""
    n = x.size
    if n == 0:
        return x  # nothing to copy

    itemsize = jnp.dtype(x.dtype).itemsize

    if n % (_SUBLANE * _LANE) == 0:
        # Lane-dense path: view as (rows, cols) with cols a wide multiple of 128
        # and rows a multiple of 8, so every tile is fully (8,128)-aligned.
        cols = _LANE
        while cols < 2048 and n % (cols * 2) == 0 and (n // (cols * 2)) % _SUBLANE == 0:
            cols *= 2
        rows = n // cols

        # Largest 8-aligned row-block that keeps one buffer <= _MAX_BLOCK_BYTES.
        max_rows = max(_SUBLANE,
                       (_MAX_BLOCK_BYTES // (cols * itemsize)) // _SUBLANE * _SUBLANE)
        if rows <= max_rows:
            block_rows = rows  # whole tensor in a single grid step
        else:
            block_rows = _SUBLANE
            r = max_rows
            while r >= _SUBLANE:
                if rows % r == 0:
                    block_rows = r
                    break
                r -= _SUBLANE

        out2d = _identity_2d(x.reshape(rows, cols), block_rows)
        return out2d.reshape(x.shape)

    # Fallback for sizes not divisible by 8*128: one full-extent block
    # (full array dims sidestep the (8,128) divisibility rule).
    if x.ndim >= 2:
        rows, cols = n // x.shape[-1], x.shape[-1]
    else:
        rows, cols = 1, n
    out2d = _identity_2d(x.reshape(rows, cols), rows)
    return out2d.reshape(x.shape)


class PredictorBasePallas:
    """Mirror of PredictorBase: abstract forward + identity logits_to_preds."""

    def __init__(self, loss=None, metrics=None):
        # No learnable parameters in the base class.
        self.loss = loss
        self.metrics = metrics

    def forward(self, x, *args, **kwargs):
        # @abstractmethod in the reference module.
        return NotImplemented

    def logits_to_preds(self, x: jax.Array) -> jax.Array:
        assert isinstance(x, jax.Array)
        return logits_to_preds(x)


if __name__ == "__main__":
    key = jax.random.PRNGKey(0)
    # Small NCHW logits tensor (batch=2, channels=4, spatial=16x16).
    x = jax.random.normal(key, (2, 4, 16, 16), dtype=jnp.float32)

    model = PredictorBasePallas()

    # Abstract forward returns NotImplemented, matching the PyTorch base class.
    assert model.forward(x) is NotImplemented

    preds = model.logits_to_preds(x)
    preds = jax.block_until_ready(preds)

    assert preds.shape == x.shape
    assert preds.dtype == x.dtype
    assert bool(jnp.array_equal(preds, x))

    print("KERNEL_OK")
</pallas_src>

<mosaic_0001>
module attributes {stable_mosaic.version = 11 : i64} {
  func.func @_copy_kernel(%arg0: i32, %arg1: memref<8x256xf32, #tpu.memory_space<vmem>>, %arg2: memref<8x256xf32, #tpu.memory_space<vmem>>) attributes {dimension_semantics = [#tpu.dimension_semantics<parallel>], iteration_bounds = array<i64: 1>, scalar_prefetch = 0 : i64, scratch_operands = 0 : i64, tpu.core_type = #tpu.core_type<tc>, window_params = [{transform_indices = @transform_0, window_bounds = array<i64: 8, 256>}, {transform_indices = @transform_1, window_bounds = array<i64: 8, 256>}]} {
    %c0 = arith.constant 0 : index
    %c0_0 = arith.constant 0 : index
    %0 = vector.load %arg1[%c0, %c0_0] : memref<8x256xf32, #tpu.memory_space<vmem>>, vector<8x256xf32>
    %c0_1 = arith.constant 0 : index
    %c0_2 = arith.constant 0 : index
    %1 = vector.load %arg2[%c0_1, %c0_2] : memref<8x256xf32, #tpu.memory_space<vmem>>, vector<8x256xf32>
    tpu.vector_store %arg2[%c0_1, %c0_2], %0 {strides = array<i32>} : memref<8x256xf32, #tpu.memory_space<vmem>>, vector<8x256xf32>,
    return
  }
  func.func @transform_0(%arg0: i32) -> (i32, i32) {
    %c0_i32 = arith.constant 0 : i32
    %c0_i32_0 = arith.constant 0 : i32
    return %arg0, %c0_i32 : i32, i32
  }
  func.func @transform_1(%arg0: i32) -> (i32, i32) {
    %c0_i32 = arith.constant 0 : i32
    %c0_i32_0 = arith.constant 0 : i32
    return %arg0, %c0_i32 : i32, i32
  }
}

</mosaic_0001>

<bundles_post_ra>
// kernel: tpu_custom_call.1
= control target key start
LH: loop header
LB: loop body
LE: loop exit
PB: predicated region body
PF: predicated region fallthrough
CT: control target
= control target key end

     0   :  { %6 = vsyncpa [#allocation3], 0  ;;  %s104_s0 = inlined_call_operand.hbm [shape: f32[8,256], index: 0, kind: input, shape index: {}, may-alias: {0,1}]   ;;  %s105_s1 = inlined_call_operand.hbm [shape: f32[8,256], index: 1, kind: output, shape index: {}, may-alias: {0,1}]  }
   0x1   :  { %7 = vsyncpa [#allocation4], 0  ;;  %s86_s6 = smov [#allocation2]  }
   0x2   :  { %s14_s7 = sshll.u32 %s86_s6, 4  ;;  %s15_s7 = int_to_ptr.vmem [resolvable:$true] %s14_s7 }
   0x3   :  { %s50_s8 = scalar_lea.vmem %s15_s7, 256  ;;  %p55_p1 = scmp.lt.s32.totalorder %s15_s7, %s15_s7 }
   0x4   :  { %p51_p0 = scmp.ne.s32.totalorder %s15_s7, %s50_s8  ;;  %p56_p2 = scmp.lt.s32.totalorder %s50_s8, %s50_s8 }
   0x6   :  { %p57_p3 = por %p56_p2, %p55_p1 }
   0x8   :  { %p58_p4 = pnand %p57_p3, %p51_p0 }
   0xa   :  { %61 = shalt.err (!%p58_p4)
}
   0xb   :  { %17 = dma.hbm_to_vmem [thread:$0]  %s104_s0, 256, %s15_s7, [#allocation3]  }
   0xc   :  { %82 = dma.done.wait [#allocation3], 256  }
   0xd   :  { %83 = vsyncadd [#allocation3], 4294967040  ;;  %s87_s11 = smov [#allocation5]   ;;  %v21_v0 = vld [vmem:[#allocation2] sm:$0xff]  ;;  %v22_v1 = vld [vmem:[#allocation2 + $0x8] sm:$0xff] }
   0xe   :  { %s31_s12 = sshll.u32 %s87_s11, 4  ;;  %23 = vst [vmem:[#allocation5] sm:$0xff] %v21_v0  ;;  %24 = vst [vmem:[#allocation5 + $0x8] sm:$0xff] %v22_v1  ;;  %s32_s12 = int_to_ptr.vmem [resolvable:$true] %s31_s12 }
   0xf   :  { %s62_s13 = scalar_lea.vmem %s32_s12, 256  ;;  %p67_p6 = scmp.lt.s32.totalorder %s32_s12, %s32_s12 }
  0x10   :  { %p63_p5 = scmp.ne.s32.totalorder %s32_s12, %s62_s13  ;;  %p68_p7 = scmp.lt.s32.totalorder %s62_s13, %s62_s13 }
  0x12   :  { %p69_p8 = por %p68_p7, %p67_p6 }
  0x14   :  { %p70_p9 = pnand %p69_p8, %p63_p5 }
  0x16   :  { %73 = shalt.err (!%p70_p9)
}
  0x17   :  { %34 = dma.vmem_to_hbm [thread:$0]  %s32_s12, 256, %s105_s1, [#allocation4]  }
  0x18   :  { %84 = dma.done.wait [#allocation4], 256  }
  0x19   :  { %85 = vsyncadd [#allocation4], 4294967040 }
  0x1a   :  { %38 = vsyncpa [#allocation3], 1 }
  0x1b   :  { %39 = vsyncpa [#allocation4], 1 }

</bundles_post_ra>
